<compile_context>
chip_gen: v7x
topology: tpu7x:2x2x1
jax: 0.10.0
libtpu: 0.0.40
codegen_flags: <defaults>
</compile_context>

<pallas_src>
import jax
import jax.numpy as jnp
from jax.experimental import pallas as pl
from jax.experimental.pallas import tpu as pltpu

_MIB = 1024 * 1024


def _round_up(x, m):
    return ((x + m - 1) // m) * m


# --------------------------------------------------------------------------- #
# Kernels
# --------------------------------------------------------------------------- #
def _mlp_head1_kernel(x_ref, w1_ref, b1_ref, w2r_ref, b2_ref, o_ref):
    """output_size == 1: out = relu(x @ W1 + b1) . w2 + b2, stored lane-dense.

    W2 arrives as an (8, H) tile (row 0 = the real weight row, rows 1..7 zero)
    so the second contraction is a sublane-aligned MXU pass that directly
    produces a lane-dense (1, TB) output row -- no 128-wide padded slab, no
    masked stores, and no extra wrapper pass over padded output columns.
    """
    x = x_ref[...].astype(w1_ref.dtype)                       # per-tile x cast only
    h = jnp.dot(x, w1_ref[...], preferred_element_type=jnp.float32)   # MXU, f32 acc
    h = jnp.maximum(h + b1_ref[...], 0.0)                     # bias + ReLU on VPU (f32)
    h = h.astype(w2r_ref.dtype)
    # (8, H) contracted with (TB, H) over H -> (8, TB); row 0 is the real result.
    out8 = jax.lax.dot_general(
        w2r_ref[...], h, (((1,), (1,)), ((), ())),
        preferred_element_type=jnp.float32)
    o_ref[...] = (out8[0:1, :] + b2_ref[...]).astype(o_ref.dtype)


def _mlp_kernel(x_ref, w1_ref, b1_ref, w2_ref, b2_ref, o_ref):
    """General path: out = relu(x @ W1 + b1) @ W2 + b2 (W2/b2 column-padded to 128)."""
    x = x_ref[...].astype(w1_ref.dtype)
    h = jnp.dot(x, w1_ref[...], preferred_element_type=jnp.float32)
    h = jnp.maximum(h + b1_ref[...], 0.0)
    h = h.astype(w2_ref.dtype)
    out = jnp.dot(h, w2_ref[...], preferred_element_type=jnp.float32) + b2_ref[...]
    o_ref[...] = out.astype(o_ref.dtype)


# --------------------------------------------------------------------------- #
# Wrapper
# --------------------------------------------------------------------------- #
def model_template_forward(x, w1, b1, w2, b2, *, block_batch=None, use_bf16=False):
    """Fused MLP forward: relu(x @ W1 + b1) @ W2 + b2 -> (batch, output_size).

    x:  (batch, input_size)        f32 (or bf16)
    w1: (input_size, hidden_size)  f32
    b1: (hidden_size,)             f32   (PyTorch-style 1-D bias)
    w2: (hidden_size, output_size) f32
    b2: (output_size,)             f32

    use_bf16=True pre-casts W1/W2 to bf16 in the wrapper and runs both matmuls
    on the bf16 MXU path (f32 accumulation).  This changes numerics; compare
    with a loose tolerance.
    """
    batch, input_size = x.shape
    hidden_size, output_size = w2.shape

    # ---- dtype plumbing: cast weights ONCE here, not per batch tile --------
    mm_dtype = jnp.bfloat16 if use_bf16 else jnp.float32
    w1c = w1.astype(mm_dtype)
    b1r = b1.reshape(1, hidden_size).astype(jnp.float32)      # f32 epilogue everywhere

    head1 = output_size == 1
    if head1:
        # Single W2 row, padded to 8 sublanes so the MXU sees an aligned tile.
        w2_arg = jnp.pad(w2.reshape(hidden_size, 1).T, ((0, 7), (0, 0))).astype(mm_dtype)
        b2_arg = b2.reshape(1, 1).astype(jnp.float32)
        out_cols = 1
    else:
        # Pad output columns to a multiple of 128 -> unmasked lane-dense stores.
        out_cols = _round_up(output_size, 128)
        w2_arg = jnp.pad(w2, ((0, 0), (0, out_cols - output_size))).astype(mm_dtype)
        b2_arg = (jnp.pad(b2, (0, out_cols - output_size))
                  .reshape(1, out_cols).astype(jnp.float32))

    # ---- VMEM budget: weights resident (single-buffered), x/out streamed ----
    try:
        vmem_cap = int(pltpu.get_tpu_info().vmem_capacity_bytes)
    except Exception:
        vmem_cap = 64 * _MIB                                   # v7x per-TC size: safe floor
    budget = min(40 * _MIB, (vmem_cap * 6) // 10)

    def _nbytes(a):
        return int(a.size) * a.dtype.itemsize

    resident = _nbytes(w1c) + _nbytes(b1r) + _nbytes(w2_arg) + _nbytes(b2_arg)
    # TODO(synk): stream W1/W2 over a hidden-dim grid axis when `resident` > budget.

    sublane = 16 if use_bf16 else 8                            # bf16 packs 16 rows/vreg
    x_row = input_size * x.dtype.itemsize
    h_row = hidden_size * 4 + (hidden_size * 2 if use_bf16 else 0)   # f32 h (+ bf16 copy)
    o_row = 4 if head1 else out_cols * 4
    bytes_per_row = 2 * x_row + 2 * o_row + h_row              # 2x: double-buffered x/out
    stream_budget = max(budget - resident, 1 * _MIB)
    max_tb = max(sublane, (stream_budget // bytes_per_row) // sublane * sublane)

    # ---- batch tiling: large tiles (default 512 rows); pad batch to a tile
    # multiple instead of divisor-searching (which could collapse to 8 rows) --
    target = 512 if block_batch is None else int(block_batch)
    target = max(sublane, min(target, max_tb))
    if batch <= target:
        bb = _round_up(batch, sublane)
        grid_steps = 1
    else:
        # Multi-tile head-1 output is (1, batch): its lane dim must be 128-aligned.
        bb = max(128, (target // 128) * 128) if head1 else (target // sublane) * sublane
        grid_steps = int(pl.cdiv(batch, bb))
    batch_padded = grid_steps * bb

    x_in = x if batch_padded == batch else jnp.pad(x, ((0, batch_padded - batch), (0, 0)))

    footprint = resident + bb * bytes_per_row + 2 * _MIB
    vmem_limit = int(min((vmem_cap * 9) // 10, max(16 * _MIB, 2 * footprint)))

    if head1:
        out_shape = jax.ShapeDtypeStruct((1, batch_padded), jnp.float32)
        out_spec = pl.BlockSpec((1, bb), lambda i: (0, i))
        kernel = _mlp_head1_kernel
        layer2_cols = 1
    else:
        out_shape = jax.ShapeDtypeStruct((batch_padded, out_cols), jnp.float32)
        out_spec = pl.BlockSpec((bb, out_cols), lambda i: (i, 0))
        kernel = _mlp_kernel
        layer2_cols = out_cols

    flops = 2 * batch_padded * hidden_size * (input_size + layer2_cols)
    bytes_accessed = int(_nbytes(x_in) + resident + batch_padded * o_row)
    cost = pl.CostEstimate(flops=flops, transcendentals=0, bytes_accessed=bytes_accessed)

    def _run(weight_mode):
        def const_spec(a):
            # Constant block index every grid step => VMEM-resident weights.
            if weight_mode is None:
                return pl.BlockSpec(a.shape, lambda i: (0, 0))
            return pl.BlockSpec(a.shape, lambda i: (0, 0), pipeline_mode=weight_mode)

        return pl.pallas_call(
            kernel,
            out_shape=out_shape,
            grid=(grid_steps,),
            in_specs=[
                pl.BlockSpec((bb, input_size), lambda i: (i, 0)),   # streamed x tiles
                const_spec(w1c),
                const_spec(b1r),
                const_spec(w2_arg),
                const_spec(b2_arg),
            ],
            out_specs=out_spec,
            compiler_params=pltpu.CompilerParams(
                dimension_semantics=("parallel",),   # shard batch tiles across TCs (v7x)
                vmem_limit_bytes=vmem_limit,
            ),
            cost_estimate=cost,
        )(x_in, w1c, b1r, w2_arg, b2_arg)

    try:
        # Weights never change across the batch grid: single buffer, half the VMEM.
        out = _run(pl.Buffered(1))
    except Exception:
        # Fallback for jax versions that reject pipeline_mode on pallas_call specs.
        out = _run(None)

    if head1:
        return out[0, :batch].reshape(batch, 1)
    return out[:batch, :output_size]


# --------------------------------------------------------------------------- #
# Helpers / demo
# --------------------------------------------------------------------------- #
def init_params(key, input_size, hidden_size, output_size):
    """Deterministic PyTorch-Linear-style uniform init (1-D biases)."""
    k1, k2, k3, k4 = jax.random.split(key, 4)
    bound1 = 1.0 / (input_size ** 0.5)
    bound2 = 1.0 / (hidden_size ** 0.5)
    w1 = jax.random.uniform(k1, (input_size, hidden_size), jnp.float32,
                            minval=-bound1, maxval=bound1)
    b1 = jax.random.uniform(k2, (hidden_size,), jnp.float32,
                            minval=-bound1, maxval=bound1)
    w2 = jax.random.uniform(k3, (hidden_size, output_size), jnp.float32,
                            minval=-bound2, maxval=bound2)
    b2 = jax.random.uniform(k4, (output_size,), jnp.float32,
                            minval=-bound2, maxval=bound2)
    return w1, b1, w2, b2


def _reference(x, w1, b1, w2, b2):
    h = jnp.maximum(
        jnp.dot(x, w1, precision=jax.lax.Precision.HIGHEST) + b1.reshape(1, -1), 0.0)
    return jnp.dot(h, w2, precision=jax.lax.Precision.HIGHEST) + b2.reshape(1, -1)


if __name__ == "__main__":
    key = jax.random.PRNGKey(0)
    ka, kb, kpa, kpb = jax.random.split(key, 4)

    # Case A: binary head (output_size == 1), single tile with batch row padding.
    batch_a, in_a, hid_a = 60, 128, 256
    xa = jax.random.normal(ka, (batch_a, in_a), jnp.float32)
    w1a, b1a, w2a, b2a = init_params(kpa, in_a, hid_a, 1)
    ya = jax.block_until_ready(model_template_forward(xa, w1a, b1a, w2a, b2a))
    ref_a = _reference(xa, w1a, b1a, w2a, b2a)
    assert ya.shape == (batch_a, 1)
    assert jnp.allclose(ya, ref_a, atol=2e-3, rtol=2e-3)

    # Case B: multi-class head (8 classes -> padded to 128 cols), tiled + padded batch.
    batch_b, in_b, hid_b, out_b = 50, 128, 128, 8
    xb = jax.random.normal(kb, (batch_b, in_b), jnp.float32)
    w1b, b1b, w2b, b2b = init_params(kpb, in_b, hid_b, out_b)
    yb = jax.block_until_ready(
        model_template_forward(xb, w1b, b1b, w2b, b2b, block_batch=16))
    ref_b = _reference(xb, w1b, b1b, w2b, b2b)
    assert yb.shape == (batch_b, out_b)
    assert jnp.allclose(yb, ref_b, atol=2e-3, rtol=2e-3)

    # Case C: bf16 MXU path (weights pre-cast in the wrapper). bf16 changes
    # numerics, so only a loose sanity tolerance is asserted here.
    yc = jax.block_until_ready(
        model_template_forward(xa, w1a, b1a, w2a, b2a, use_bf16=True))
    assert yc.shape == (batch_a, 1)
    assert jnp.allclose(yc, ref_a, atol=1e-1, rtol=1e-1)

    print("KERNEL_OK")
</pallas_src>

<mosaic_0001>
module attributes {stable_mosaic.version = 11 : i64} {
  func.func @_mlp_head1_kernel(%arg0: i32, %arg1: memref<64x128xf32, #tpu.memory_space<vmem>>, %arg2: memref<128x256xf32, #tpu.memory_space<vmem>>, %arg3: memref<1x256xf32, #tpu.memory_space<vmem>>, %arg4: memref<8x256xf32, #tpu.memory_space<vmem>>, %arg5: memref<1x1xf32, #tpu.memory_space<vmem>>, %arg6: memref<1x64xf32, #tpu.memory_space<vmem>>) attributes {dimension_semantics = [#tpu.dimension_semantics<parallel>], iteration_bounds = array<i64: 1>, scalar_prefetch = 0 : i64, scratch_operands = 0 : i64, tpu.core_type = #tpu.core_type<tc>, window_params = [{transform_indices = @transform_0, window_bounds = array<i64: 64, 128>}, {pipeline_mode = #tpu.pipeline_mode<synchronous>, transform_indices = @transform_1, window_bounds = array<i64: 128, 256>}, {pipeline_mode = #tpu.pipeline_mode<synchronous>, transform_indices = @transform_2, window_bounds = array<i64: 1, 256>}, {pipeline_mode = #tpu.pipeline_mode<synchronous>, transform_indices = @transform_3, window_bounds = array<i64: 8, 256>}, {pipeline_mode = #tpu.pipeline_mode<synchronous>, transform_indices = @transform_4, window_bounds = array<i64: 1, 1>}, {transform_indices = @transform_5, window_bounds = array<i64: 1, 64>}]} {
    %c0 = arith.constant 0 : index
    %c0_0 = arith.constant 0 : index
    %0 = vector.load %arg1[%c0, %c0_0] : memref<64x128xf32, #tpu.memory_space<vmem>>, vector<64x128xf32>
    %c0_1 = arith.constant 0 : index
    %c0_2 = arith.constant 0 : index
    %1 = vector.load %arg2[%c0_1, %c0_2] : memref<128x256xf32, #tpu.memory_space<vmem>>, vector<128x256xf32>
    %cst = arith.constant dense<0.000000e+00> : vector<64x256xf32>
    %2 = tpu.matmul %0, %1, %cst {dimension_numbers = #tpu.dot_dimension_numbers<[1], [0], [0], [1], [0, 0, 1, 1], [], []>} : vector<64x128xf32>, vector<128x256xf32>, vector<64x256xf32> -> vector<64x256xf32>
    %c0_3 = arith.constant 0 : index
    %c0_4 = arith.constant 0 : index
    %3 = vector.load %arg3[%c0_3, %c0_4] : memref<1x256xf32, #tpu.memory_space<vmem>>, vector<1x256xf32>
    %4 = vector.broadcast %3 : vector<1x256xf32> to vector<64x256xf32>
    %5 = arith.addf %2, %4 : vector<64x256xf32>
    %cst_5 = arith.constant 0.000000e+00 : f32
    %6 = vector.broadcast %cst_5 : f32 to vector<64x256xf32>
    %7 = arith.maximumf %5, %6 : vector<64x256xf32>
    %c0_6 = arith.constant 0 : index
    %c0_7 = arith.constant 0 : index
    %8 = vector.load %arg4[%c0_6, %c0_7] : memref<8x256xf32, #tpu.memory_space<vmem>>, vector<8x256xf32>
    %cst_8 = arith.constant dense<0.000000e+00> : vector<8x64xf32>
    %9 = tpu.matmul %8, %7, %cst_8 {dimension_numbers = #tpu.dot_dimension_numbers<[1], [1], [0], [0], [0, 0, 1, 0], [], []>} : vector<8x256xf32>, vector<64x256xf32>, vector<8x64xf32> -> vector<8x64xf32>
    %10 = vector.extract_strided_slice %9 {offsets = [0, 0], sizes = [1, 64], strides = [1, 1]} : vector<8x64xf32> to vector<1x64xf32>
    %c0_9 = arith.constant 0 : index
    %c0_10 = arith.constant 0 : index
    %11 = vector.load %arg5[%c0_9, %c0_10] : memref<1x1xf32, #tpu.memory_space<vmem>>, vector<1x1xf32>
    %12 = vector.broadcast %11 : vector<1x1xf32> to vector<1x64xf32>
    %13 = arith.addf %10, %12 : vector<1x64xf32>
    %c0_11 = arith.constant 0 : index
    %c0_12 = arith.constant 0 : index
    %14 = vector.load %arg6[%c0_11, %c0_12] : memref<1x64xf32, #tpu.memory_space<vmem>>, vector<1x64xf32>
    tpu.vector_store %arg6[%c0_11, %c0_12], %13 {strides = array<i32>} : memref<1x64xf32, #tpu.memory_space<vmem>>, vector<1x64xf32>,
    return
  }
  func.func @transform_0(%arg0: i32) -> (i32, i32) {
    %c0_i32 = arith.constant 0 : i32
    %c0_i32_0 = arith.constant 0 : i32
    return %arg0, %c0_i32 : i32, i32
  }
  func.func @transform_1(%arg0: i32) -> (i32, i32) {
    %c0_i32 = arith.constant 0 : i32
    %c0_i32_0 = arith.constant 0 : i32
    %c0_i32_1 = arith.constant 0 : i32
    return %c0_i32, %c0_i32_0 : i32, i32
  }
  func.func @transform_2(%arg0: i32) -> (i32, i32) {
    %c0_i32 = arith.constant 0 : i32
    %c0_i32_0 = arith.constant 0 : i32
    %c0_i32_1 = arith.constant 0 : i32
    return %c0_i32, %c0_i32_0 : i32, i32
  }
  func.func @transform_3(%arg0: i32) -> (i32, i32) {
    %c0_i32 = arith.constant 0 : i32
    %c0_i32_0 = arith.constant 0 : i32
    %c0_i32_1 = arith.constant 0 : i32
    return %c0_i32, %c0_i32_0 : i32, i32
  }
  func.func @transform_4(%arg0: i32) -> (i32, i32) {
    %c0_i32 = arith.constant 0 : i32
    %c0_i32_0 = arith.constant 0 : i32
    %c0_i32_1 = arith.constant 0 : i32
    return %c0_i32, %c0_i32_0 : i32, i32
  }
  func.func @transform_5(%arg0: i32) -> (i32, i32) {
    %c0_i32 = arith.constant 0 : i32
    %c0_i32_0 = arith.constant 0 : i32
    return %c0_i32, %arg0 : i32, i32
  }
}

module attributes {stable_mosaic.version = 11 : i64} {
  func.func @_mlp_head1_kernel(%arg0: i32, %arg1: memref<64x128xf32, #tpu.memory_space<vmem>>, %arg2: memref<128x256xf32, #tpu.memory_space<vmem>>, %arg3: memref<1x256xf32, #tpu.memory_space<vmem>>, %arg4: memref<8x256xf32, #tpu.memory_space<vmem>>, %arg5: memref<1x1xf32, #tpu.memory_space<vmem>>, %arg6: memref<1x64xf32, #tpu.memory_space<vmem>>) attributes {dimension_semantics = [#tpu.dimension_semantics<parallel>], iteration_bounds = array<i64: 1>, scalar_prefetch = 0 : i64, scratch_operands = 0 : i64, tpu.core_type = #tpu.core_type<tc>, window_params = [{transform_indices = @transform_0, window_bounds = array<i64: 64, 128>}, {pipeline_mode = #tpu.pipeline_mode<synchronous>, transform_indices = @transform_1, window_bounds = array<i64: 128, 256>}, {pipeline_mode = #tpu.pipeline_mode<synchronous>, transform_indices = @transform_2, window_bounds = array<i64: 1, 256>}, {pipeline_mode = #tpu.pipeline_mode<synchronous>, transform_indices = @transform_3, window_bounds = array<i64: 8, 256>}, {pipeline_mode = #tpu.pipeline_mode<synchronous>, transform_indices = @transform_4, window_bounds = array<i64: 1, 1>}, {transform_indices = @transform_5, window_bounds = array<i64: 1, 64>}]} {
    %c0 = arith.constant 0 : index
    %c0_0 = arith.constant 0 : index
    %0 = vector.load %arg1[%c0, %c0_0] : memref<64x128xf32, #tpu.memory_space<vmem>>, vector<64x128xf32>
    %c0_1 = arith.constant 0 : index
    %c0_2 = arith.constant 0 : index
    %1 = vector.load %arg2[%c0_1, %c0_2] : memref<128x256xf32, #tpu.memory_space<vmem>>, vector<128x256xf32>
    %cst = arith.constant dense<0.000000e+00> : vector<64x256xf32>
    %2 = tpu.matmul %0, %1, %cst {dimension_numbers = #tpu.dot_dimension_numbers<[1], [0], [0], [1], [0, 0, 1, 1], [], []>} : vector<64x128xf32>, vector<128x256xf32>, vector<64x256xf32> -> vector<64x256xf32>
    %c0_3 = arith.constant 0 : index
    %c0_4 = arith.constant 0 : index
    %3 = vector.load %arg3[%c0_3, %c0_4] : memref<1x256xf32, #tpu.memory_space<vmem>>, vector<1x256xf32>
    %4 = vector.broadcast %3 : vector<1x256xf32> to vector<64x256xf32>
    %5 = arith.addf %2, %4 : vector<64x256xf32>
    %cst_5 = arith.constant 0.000000e+00 : f32
    %6 = vector.broadcast %cst_5 : f32 to vector<64x256xf32>
    %7 = arith.maximumf %5, %6 : vector<64x256xf32>
    %c0_6 = arith.constant 0 : index
    %c0_7 = arith.constant 0 : index
    %8 = vector.load %arg4[%c0_6, %c0_7] : memref<8x256xf32, #tpu.memory_space<vmem>>, vector<8x256xf32>
    %cst_8 = arith.constant dense<0.000000e+00> : vector<8x64xf32>
    %9 = tpu.matmul %8, %7, %cst_8 {dimension_numbers = #tpu.dot_dimension_numbers<[1], [1], [0], [0], [0, 0, 1, 0], [], []>} : vector<8x256xf32>, vector<64x256xf32>, vector<8x64xf32> -> vector<8x64xf32>
    %10 = vector.extract_strided_slice %9 {offsets = [0, 0], sizes = [1, 64], strides = [1, 1]} : vector<8x64xf32> to vector<1x64xf32>
    %c0_9 = arith.constant 0 : index
    %c0_10 = arith.constant 0 : index
    %11 = vector.load %arg5[%c0_9, %c0_10] : memref<1x1xf32, #tpu.memory_space<vmem>>, vector<1x1xf32>
    %12 = vector.broadcast %11 : vector<1x1xf32> to vector<1x64xf32>
    %13 = arith.addf %10, %12 : vector<1x64xf32>
    %c0_11 = arith.constant 0 : index
    %c0_12 = arith.constant 0 : index
    %14 = vector.load %arg6[%c0_11, %c0_12] : memref<1x64xf32, #tpu.memory_space<vmem>>, vector<1x64xf32>
    tpu.vector_store %arg6[%c0_11, %c0_12], %13 {strides = array<i32>} : memref<1x64xf32, #tpu.memory_space<vmem>>, vector<1x64xf32>,
    return
  }
  func.func @transform_0(%arg0: i32) -> (i32, i32) {
    %c0_i32 = arith.constant 0 : i32
    %c0_i32_0 = arith.constant 0 : i32
    return %arg0, %c0_i32 : i32, i32
  }
  func.func @transform_1(%arg0: i32) -> (i32, i32) {
    %c0_i32 = arith.constant 0 : i32
    %c0_i32_0 = arith.constant 0 : i32
    %c0_i32_1 = arith.constant 0 : i32
    return %c0_i32, %c0_i32_0 : i32, i32
  }
  func.func @transform_2(%arg0: i32) -> (i32, i32) {
    %c0_i32 = arith.constant 0 : i32
    %c0_i32_0 = arith.constant 0 : i32
    %c0_i32_1 = arith.constant 0 : i32
    return %c0_i32, %c0_i32_0 : i32, i32
  }
  func.func @transform_3(%arg0: i32) -> (i32, i32) {
    %c0_i32 = arith.constant 0 : i32
    %c0_i32_0 = arith.constant 0 : i32
    %c0_i32_1 = arith.constant 0 : i32
    return %c0_i32, %c0_i32_0 : i32, i32
  }
  func.func @transform_4(%arg0: i32) -> (i32, i32) {
    %c0_i32 = arith.constant 0 : i32
    %c0_i32_0 = arith.constant 0 : i32
    %c0_i32_1 = arith.constant 0 : i32
    return %c0_i32, %c0_i32_0 : i32, i32
  }
  func.func @transform_5(%arg0: i32) -> (i32, i32) {
    %c0_i32 = arith.constant 0 : i32
    %c0_i32_0 = arith.constant 0 : i32
    return %c0_i32, %arg0 : i32, i32
  }
}

</mosaic_0001>

<bundles_post_ra>
// kernel: tpu_custom_call.1
= control target key start
LH: loop header
LB: loop body
LE: loop exit
PB: predicated region body
PF: predicated region fallthrough
CT: control target
= control target key end

     0   :  { %s607_s0 = inlined_call_operand.hbm [shape: f32[64,128], index: 0, kind: input, shape index: {}]   ;;  %s608_s1 = inlined_call_operand.hbm [shape: f32[128,256], index: 1, kind: input, shape index: {}]   ;;  %s609_s2 = inlined_call_operand.vmem [shape: f32[1,256], index: 2, kind: input, shape index: {}]   ;;  %s610_s3 = inlined_call_operand.hbm [shape: f32[8,256], index: 3, kind: input, shape index: {}]   ;;  %s611_s4 = inlined_call_operand.<no memory space> [shape: f32[1,1], index: 4, kind: input, shape index: {}]   ;;  %s612_s5 = inlined_call_operand.hbm [shape: f32[1,64], index: 5, kind: output, shape index: {}]  }
   0x1   :  { %v10_v0 = vstv %s611_s4 }
   0x2   :  { %11 = vst [vmem:[#allocation2] sm:$0x1] %v10_v0 }
   0x3   :  { %12 = vsyncpa [#allocation4], 0 }
   0x4   :  { %13 = vsyncpa [#allocation7], 0 }
   0x5   :  { %14 = vsyncpa [#allocation5], 0  ;;  %s497_s20 = smov [#allocation6]   ;;  %s403_s24 = scalar_lea.hbm %s608_s1, 4096 }
   0x6   :  { %s32_s21 = sshll.u32 %s497_s20, 4  ;;  %p404_p0 = scmp.ne.s32.totalorder %s608_s1, %s403_s24  ;;  %s33_s21 = int_to_ptr.vmem [resolvable:$true] %s32_s21 }
   0x7   :  { %p407_p1 = scmp.lt.u32.totalorder %s403_s24, %s608_s1 }
   0x9   :  { %p409_p2 = pnand %p407_p1, %p404_p0 }
   0xb   :  { %412 = shalt.err (!%p409_p2)
}
   0xc   :  { %s413_s4 = scalar_lea.vmem %s33_s21, 4096  ;;  %p418_p4 = scmp.lt.s32.totalorder %s33_s21, %s33_s21 }
   0xd   :  { %p414_p3 = scmp.ne.s32.totalorder %s33_s21, %s413_s4  ;;  %p419_p5 = scmp.lt.s32.totalorder %s413_s4, %s413_s4 }
   0xf   :  { %p420_p6 = por %p419_p5, %p418_p4 }
  0x11   :  { %p421_p7 = pnand %p420_p6, %p414_p3 }
  0x13   :  { %424 = shalt.err (!%p421_p7)
}
  0x14   :  { %s498_s29 = smov 256   ;;  %s499_s30 = smov 16  }
  0x15   :  { %38 = dma.hbm_to_vmem [thread:$0]  %s608_s1, 4096, %s33_s21, [#allocation7], %s498_s29, %s498_s29, %s499_s30  }
  0x16   :  { %s500_s8 = smov [#allocation3]   ;;  %s425_s12 = scalar_lea.hbm %s607_s0, 1024 }
  0x17   :  { %s20_s9 = sshll.u32 %s500_s8, 4  ;;  %p426_p8 = scmp.ne.s32.totalorder %s607_s0, %s425_s12  ;;  %s21_s9 = int_to_ptr.vmem [resolvable:$true] %s20_s9 }
  0x18   :  { %p429_p9 = scmp.lt.u32.totalorder %s425_s12, %s607_s0 }
  0x1a   :  { %p431_p10 = pnand %p429_p9, %p426_p8 }
  0x1c   :  { %434 = shalt.err (!%p431_p10)
}
  0x1d   :  { %s435_s17 = scalar_lea.vmem %s21_s9, 1024  ;;  %p440_p12 = scmp.lt.s32.totalorder %s21_s9, %s21_s9 }
  0x1e   :  { %p436_p11 = scmp.ne.s32.totalorder %s21_s9, %s435_s17  ;;  %p441_p13 = scmp.lt.s32.totalorder %s435_s17, %s435_s17 }
  0x20   :  { %p442_p0 = por %p441_p13, %p440_p12 }
  0x22   :  { %p443_p1 = pnand %p442_p0, %p436_p11 }
  0x24   :  { %446 = shalt.err (!%p443_p1)
}
  0x25   :  { %s501_s1 = smov 128   ;;  %s502_s18 = smov 8  }
  0x26   :  { %26 = dma.hbm_to_vmem [thread:$0]  %s607_s0, 1024, %s21_s9, [#allocation4], %s501_s1, %s501_s1, %s502_s18  }
  0x27   :  { %s503_s21 = smov [#allocation8]   ;;  %s447_s25 = scalar_lea.hbm %s610_s3, 256 }
  0x28   :  { %s47_s22 = sshll.u32 %s503_s21, 4  ;;  %p448_p2 = scmp.ne.s32.totalorder %s610_s3, %s447_s25  ;;  %s48_s22 = int_to_ptr.vmem [resolvable:$true] %s47_s22 }
  0x29   :  { %p451_p3 = scmp.lt.u32.totalorder %s447_s25, %s610_s3 }
  0x2b   :  { %p453_p4 = pnand %p451_p3, %p448_p2 }
  0x2d   :  { %456 = shalt.err (!%p453_p4)
}
  0x2e   :  { %s457_s29 = scalar_lea.vmem %s48_s22, 256  ;;  %p462_p6 = scmp.lt.s32.totalorder %s48_s22, %s48_s22 }
  0x2f   :  { %p458_p5 = scmp.ne.s32.totalorder %s48_s22, %s457_s29  ;;  %p463_p7 = scmp.lt.s32.totalorder %s457_s29, %s457_s29 }
  0x31   :  { %p464_p8 = por %p463_p7, %p462_p6 }
  0x33   :  { %p465_p9 = pnand %p464_p8, %p458_p5 }
  0x35   :  { %468 = shalt.err (!%p465_p9)
}
  0x36   :  { %50 = dma.hbm_to_vmem [thread:$0]  %s610_s3, 256, %s48_s22, [#allocation7]  }
  0x37   :  { %491 = dma.done.wait [#allocation4], 1024  }
  0x38   :  { %492 = vsyncadd [#allocation4], 4294966272 }
  0x39   :  { %493 = dma.done.wait [#allocation7], 4352  }
  0x3a   :  { %494 = vsyncadd [#allocation7], 4294962944  ;;  %v504_v1 = vmov 0.0   ;;  %v71_v2 = vld [vmem:[#allocation6 + $0x8] sm:$0xff]  ;;  %v73_v3 = vld [vmem:[#allocation6 + $0x18] sm:$0xff]  ;;  %v505_v60 = vmov 0   ;;  %v104_v61 = vlaneseq }
  0x3b   :  { %178 = vmatprep.mubr.f32.mxu0 %v504_v1  ;;  %v70_v4 = vld [vmem:[#allocation6] sm:$0xff]  ;;  %v344_v5 = vpack.c.bf16 %v73_v3, %v71_v2  ;;  %v72_v6 = vld [vmem:[#allocation6 + $0x10] sm:$0xff]  ;;  %v75_v7 = vld [vmem:[#allocation6 + $0x28] sm:$0xff]  ;;  %402 = vset.pattern.permute.xlu0 %v505_v60  ;;  %vm326_vm0 = vcmask 516096  }
  0x3c   :  { %v77_v8 = vld [vmem:[#allocation6 + $0x38] sm:$0xff]  ;;  %v346_v9 = vpack.c.bf16 %v72_v6, %v70_v4  ;;  %v74_v11 = vld [vmem:[#allocation6 + $0x20] sm:$0xff]  ;;  %v76_v12 = vld [vmem:[#allocation6 + $0x30] sm:$0xff]  ;;  %v584_v62 = vshrl.u32 %v104_v61, 7 }
  0x3d   :  { %v348_v10 = vpack.c.bf16 %v77_v8, %v75_v7  ;;  %v79_v13 = vld [vmem:[#allocation6 + $0x48] sm:$0xff]  ;;  %345 = vmatprep.subr.bf16.mxu0 %v344_v5  ;;  %v81_v14 = vld [vmem:[#allocation6 + $0x58] sm:$0xff]  ;;  %v350_v15 = vpack.c.bf16 %v76_v12, %v74_v11  ;;  %v78_v17 = vld [vmem:[#allocation6 + $0x40] sm:$0xff] }
  0x3e   :  { %347 = vmatpush1.bf16.msra.mxu0 %v346_v9  ;;  %v352_v16 = vpack.c.bf16 %v81_v14, %v79_v13  ;;  %v80_v18 = vld [vmem:[#allocation6 + $0x50] sm:$0xff]  ;;  %v83_v19 = vld [vmem:[#allocation6 + $0x68] sm:$0xff]  ;;  %v85_v20 = vld [vmem:[#allocation6 + $0x78] sm:$0xff]  ;;  %v106_v63 = vsub.s32 0, %v584_v62  ;;  %v110_v2 = vsub.s32 1, %v584_v62 }
  0x3f   :  { %349 = vmatprep.subr.bf16.mxu0 %v348_v10  ;;  %v354_v21 = vpack.c.bf16 %v80_v18, %v78_v17  ;;  %v356_v22 = vpack.c.bf16 %v85_v20, %v83_v19  ;;  %v82_v23 = vld [vmem:[#allocation6 + $0x60] sm:$0xff]  ;;  %v84_v24 = vld [vmem:[#allocation6 + $0x70] sm:$0xff]  ;;  %v87_v25 = vld [vmem:[#allocation6 + $0x88] sm:$0xff] }
  0x40   :  { %v89_v26 = vld [vmem:[#allocation6 + $0x98] sm:$0xff]  ;;  %v358_v27 = vpack.c.bf16 %v84_v24, %v82_v23  ;;  %v86_v29 = vld [vmem:[#allocation6 + $0x80] sm:$0xff]  ;;  %v88_v30 = vld [vmem:[#allocation6 + $0x90] sm:$0xff] }
  0x41   :  { %v360_v28 = vpack.c.bf16 %v89_v26, %v87_v25  ;;  %v91_v31 = vld [vmem:[#allocation6 + $0xa8] sm:$0xff]  ;;  %v93_v32 = vld [vmem:[#allocation6 + $0xb8] sm:$0xff]  ;;  %v362_v33 = vpack.c.bf16 %v88_v30, %v86_v29  ;;  %v90_v35 = vld [vmem:[#allocation6 + $0xa0] sm:$0xff] }
  0x42   :  { %351 = vmatpush1.bf16.msra.mxu0 %v350_v15  ;;  %v364_v34 = vpack.c.bf16 %v93_v32, %v91_v31  ;;  %v92_v36 = vld [vmem:[#allocation6 + $0xb0] sm:$0xff]  ;;  %v95_v37 = vld [vmem:[#allocation6 + $0xc8] sm:$0xff]  ;;  %v97_v38 = vld [vmem:[#allocation6 + $0xd8] sm:$0xff] }
  0x43   :  { %353 = vmatprep.subr.bf16.mxu0 %v352_v16  ;;  %v366_v39 = vpack.c.bf16 %v92_v36, %v90_v35  ;;  %v368_v40 = vpack.c.bf16 %v97_v38, %v95_v37  ;;  %v94_v41 = vld [vmem:[#allocation6 + $0xc0] sm:$0xff]  ;;  %v96_v42 = vld [vmem:[#allocation6 + $0xd0] sm:$0xff]  ;;  %v99_v43 = vld [vmem:[#allocation6 + $0xe8] sm:$0xff] }
  0x44   :  { %v101_v44 = vld [vmem:[#allocation6 + $0xf8] sm:$0xff]  ;;  %v370_v45 = vpack.c.bf16 %v96_v42, %v94_v41  ;;  %v98_v47 = vld [vmem:[#allocation6 + $0xe0] sm:$0xff]  ;;  %v100_v48 = vld [vmem:[#allocation6 + $0xf0] sm:$0xff] }
  0x45   :  { %v372_v46 = vpack.c.bf16 %v101_v44, %v99_v43  ;;  %v374_v49 = vpack.c.bf16 %v100_v48, %v98_v47  ;;  %v62_v50 = vld [vmem:[#allocation3] sm:$0xff]  ;;  %v63_v51 = vld [vmem:[#allocation3 + $0x8] sm:$0xff]  ;;  %v64_v52 = vld [vmem:[#allocation3 + $0x10] sm:$0xff] }
  0x46   :  { %355 = vmatpush1.bf16.msra.mxu0 %v354_v21  ;;  %v65_v53 = vld [vmem:[#allocation3 + $0x18] sm:$0xff]  ;;  %v66_v54 = vld [vmem:[#allocation3 + $0x20] sm:$0xff]  ;;  %v67_v55 = vld [vmem:[#allocation3 + $0x28] sm:$0xff] }
  0x47   :  { %357 = vmatprep.subr.bf16.mxu0 %v356_v22  ;;  %v68_v56 = vld [vmem:[#allocation3 + $0x30] sm:$0xff]  ;;  %v69_v57 = vld [vmem:[#allocation3 + $0x38] sm:$0xff]  ;;  %v244_v58 = vld [vmem:[#allocation8 + $0x8] sm:$0xff] }
  0x48   :  { %309 = vmatprep.mubr.f32.mxu1 %v244_v58  ;;  %v315_v59 = vld [vmem:[#allocation2] sm:$0x1]  ;;  %v243_v60 = vld [vmem:[#allocation8] sm:$0xff] }
  0x49   :  { %318 = vperm.xlu0 %402, %v315_v59   ;;  %v102_v0 = vld [vmem:[%s609_s2] sm:$0x3]  ;;  %s506_s2 = smov [#allocation9]  }
  0x4a   :  { %359 = vmatpush1.bf16.msra.mxu0 %v358_v27  ;;  %v111_v4 = vrot.slane %v102_v0, %v110_v2  ;;  %s334_s7 = sshll.u32 %s506_s2, 4  ;;  %s335_s7 = int_to_ptr.vmem [resolvable:$true] %s334_s7 }
  0x4b   :  { %361 = vmatprep.subr.bf16.mxu0 %v360_v28  ;;  %s469_s8 = scalar_lea.vmem %s335_s7, 16  ;;  %s473_s9 = scalar_lea.vmem %s335_s7, 32 }
  0x4c   :  { %p470_p10 = scmp.ne.s32.totalorder %s335_s7, %s469_s8  ;;  %p474_p11 = scmp.lt.s32.totalorder %s335_s7, %s335_s7 }
  0x4d   :  { %p475_p12 = scmp.lt.s32.totalorder %s473_s9, %s469_s8 }
  0x4e   :  { %363 = vmatpush1.bf16.msra.mxu0 %v362_v33 }
  0x4f   :  { %365 = vmatprep.subr.bf16.mxu0 %v364_v34  ;;  %p476_p13 = por %p475_p12, %p474_p11 }
  0x51   :  { %p477_p0 = pnand %p476_p13, %p470_p10 }
  0x52   :  { %367 = vmatpush1.bf16.msra.mxu0 %v366_v39 }
  0x53   :  { %369 = vmatprep.subr.bf16.mxu0 %v368_v40 }
  0x56   :  { %371 = vmatpush1.bf16.msra.mxu0 %v370_v45 }
  0x57   :  { %373 = vmatprep.subr.bf16.mxu0 %v372_v46 }
  0x5a   :  { %375 = vmatpush1.bf16.msra.mxu0 %v374_v49 }
  0x5d   :  { %179 = vmatmul.mubr.f32.vlgmr.msra.gmra.mrb[0].mxu0 %v62_v50 }
  0x5e   :  { %184 = vmatprep.mubr.f32.mxu0 %v504_v1 }
  0x61   :  { %185 = vmatmul.mubr.f32.gmra.mrb[2].mxu0 %v63_v51 }
  0x62   :  { %190 = vmatprep.mubr.f32.mxu0 %v504_v1 }
  0x65   :  { %191 = vmatmul.mubr.f32.gmra.mrb[4].mxu0 %v64_v52 }
  0x66   :  { %196 = vmatprep.mubr.f32.mxu0 %v504_v1 }
  0x69   :  { %197 = vmatmul.mubr.f32.gmra.mrb[6].mxu0 %v65_v53 }
  0x6a   :  { %202 = vmatprep.mubr.f32.mxu0 %v504_v1 }
  0x6d   :  { %203 = vmatmul.mubr.f32.gmra.mrb[8].mxu0 %v66_v54 }
  0x6e   :  { %208 = vmatprep.mubr.f32.mxu0 %v504_v1 }
  0x71   :  { %209 = vmatmul.mubr.f32.gmra.mrb[10].mxu0 %v67_v55 }
  0x72   :  { %214 = vmatprep.mubr.f32.mxu0 %v504_v1 }
  0x75   :  { %215 = vmatmul.mubr.f32.gmra.mrb[12].mxu0 %v68_v56 }
  0x76   :  { %220 = vmatprep.mubr.f32.mxu0 %v504_v1  ;;  %v107_v1 = vrot.slane %v102_v0, %v106_v63 }
  0x79   :  { %221 = vmatmul.mubr.f32.gmra.mrb[14].mxu0 %v69_v57 }
  0xc8   :  { %v319_v61 = vpop.permute.xlu0 %318 }
  0xc9   :  { %v324_v0 = vrot.slane %v319_v61, %v106_v63 }
 0x130   :  { %v180_v3 = vpop.f32.mrb[0].mxu0 }
 0x131   :  { %v182_v5 = vpop.f32.mrb[1].mxu0  ;;  %v181_v6 = vadd.f32 %v180_v3, %v107_v1 }
 0x132   :  { %v183_v7 = vadd.f32 %v182_v5, %v111_v4 }
 0x133   :  { %v227_v12 = vmax.f32 %v181_v6, 0.0 }
 0x134   :  { %v186_v8 = vpop.f32.mrb[2].mxu0  ;;  %v228_v14 = vmax.f32 %v183_v7, 0.0 }
 0x135   :  { %v187_v9 = vadd.f32 %v186_v8, %v107_v1  ;;  %v188_v10 = vpop.f32.mrb[3].mxu0 }
 0x136   :  { %v189_v11 = vadd.f32 %v188_v10, %v111_v4 }
 0x137   :  { %v229_v13 = vmax.f32 %v187_v9, 0.0 }
 0x138   :  { %v230_v15 = vmax.f32 %v189_v11, 0.0  ;;  %v192_v16 = vpop.f32.mrb[4].mxu0 }
 0x139   :  { %v194_v17 = vpop.f32.mrb[5].mxu0  ;;  %v378_v18 = vpack.c.bf16 %v229_v13, %v227_v12  ;;  %v193_v20 = vadd.f32 %v192_v16, %v107_v1 }
 0x13a   :  { %v376_v19 = vpack.c.bf16 %v230_v15, %v228_v14  ;;  %v195_v21 = vadd.f32 %v194_v17, %v111_v4 }
 0x13b   :  { %v231_v26 = vmax.f32 %v193_v20, 0.0 }
 0x13c   :  { %v198_v22 = vpop.f32.mrb[6].mxu0  ;;  %377 = vmatprep.subr.bf16.mxu1 %v376_v19  ;;  %v232_v28 = vmax.f32 %v195_v21, 0.0 }
 0x13d   :  { %v199_v23 = vadd.f32 %v198_v22, %v107_v1  ;;  %v200_v24 = vpop.f32.mrb[7].mxu0  ;;  %379 = vmatpush1.bf16.xpose.msra.mxu1 %v378_v18 }
 0x13e   :  { %v201_v25 = vadd.f32 %v200_v24, %v111_v4 }
 0x13f   :  { %v233_v27 = vmax.f32 %v199_v23, 0.0 }
 0x140   :  { %v234_v29 = vmax.f32 %v201_v25, 0.0  ;;  %v204_v30 = vpop.f32.mrb[8].mxu0 }
 0x141   :  { %v382_v31 = vpack.c.bf16 %v233_v27, %v231_v26  ;;  %v206_v32 = vpop.f32.mrb[9].mxu0  ;;  %v205_v34 = vadd.f32 %v204_v30, %v107_v1 }
 0x142   :  { %v380_v33 = vpack.c.bf16 %v234_v29, %v232_v28  ;;  %v207_v35 = vadd.f32 %v206_v32, %v111_v4 }
 0x143   :  { %v235_v40 = vmax.f32 %v205_v34, 0.0 }
 0x144   :  { %v210_v36 = vpop.f32.mrb[10].mxu0  ;;  %381 = vmatprep.subr.bf16.mxu1 %v380_v33  ;;  %v236_v42 = vmax.f32 %v207_v35, 0.0 }
 0x145   :  { %v211_v37 = vadd.f32 %v210_v36, %v107_v1  ;;  %v212_v38 = vpop.f32.mrb[11].mxu0  ;;  %383 = vmatpush1.bf16.xpose.msra.mxu1 %v382_v31 }
 0x146   :  { %v213_v39 = vadd.f32 %v212_v38, %v111_v4 }
 0x147   :  { %v237_v41 = vmax.f32 %v211_v37, 0.0 }
 0x148   :  { %v238_v43 = vmax.f32 %v213_v39, 0.0  ;;  %v216_v44 = vpop.f32.mrb[12].mxu0 }
 0x149   :  { %v386_v45 = vpack.c.bf16 %v237_v41, %v235_v40  ;;  %v218_v46 = vpop.f32.mrb[13].mxu0  ;;  %v217_v48 = vadd.f32 %v216_v44, %v107_v1 }
 0x14a   :  { %v384_v47 = vpack.c.bf16 %v238_v43, %v236_v42  ;;  %v219_v49 = vadd.f32 %v218_v46, %v111_v4 }
 0x14b   :  { %v239_v54 = vmax.f32 %v217_v48, 0.0 }
 0x14c   :  { %v222_v50 = vpop.f32.mrb[14].mxu0  ;;  %385 = vmatprep.subr.bf16.mxu1 %v384_v47  ;;  %v240_v56 = vmax.f32 %v219_v49, 0.0 }
 0x14d   :  { %v223_v51 = vadd.f32 %v222_v50, %v107_v1  ;;  %v224_v52 = vpop.f32.mrb[15].mxu0  ;;  %387 = vmatpush1.bf16.xpose.msra.mxu1 %v386_v45 }
 0x14e   :  { %v225_v53 = vadd.f32 %v224_v52, %v111_v4 }
 0x14f   :  { %v241_v55 = vmax.f32 %v223_v51, 0.0 }
 0x150   :  { %v242_v57 = vmax.f32 %v225_v53, 0.0 }
 0x151   :  { %v390_v58 = vpack.c.bf16 %v241_v55, %v239_v54 }
 0x152   :  { %v388_v59 = vpack.c.bf16 %v242_v57, %v240_v56 }
 0x154   :  { %389 = vmatprep.subr.bf16.mxu1 %v388_v59 }
 0x155   :  { %391 = vmatpush1.bf16.xpose.msra.mxu1 %v390_v58 }
 0x15c   :  { %310 = vmatmul.mubr.f32.vlgmr.msra.gmra.mrb[0].mxu1 %v243_v60 }
 0x22f   :  { %v311_v2 = vpop.f32.mrb[0].mxu1 }
 0x230   :  { %v325_v1 = vadd.f32 %v324_v0, %v311_v2  ;;  %v313_v3 = vpop.f32.mrb[1].mxu1 }
 0x232   :  { %327 = vst.msk [vmem:[#allocation9] sm:$0x1] %vm326_vm0, %v325_v1 }
 0x233   :  { %480 = shalt.err (!%p477_p0)
}
 0x234   :  { %s481_s12 = scalar_lea.hbm %s612_s5, 16 }
 0x235   :  { %p482_p1 = scmp.ne.s32.totalorder %s612_s5, %s481_s12  ;;  %p485_p2 = scmp.lt.u32.totalorder %s481_s12, %s612_s5 }
 0x237   :  { %p487_p3 = pnand %p485_p2, %p482_p1 }
 0x239   :  { %490 = shalt.err (!%p487_p3)
}
 0x23a   :  { %337 = dma.vmem_to_hbm [thread:$0]  %s335_s7, 16, %s612_s5, [#allocation5]  }
 0x23b   :  { %495 = dma.done.wait [#allocation5], 16  }
 0x23c   :  { %496 = vsyncadd [#allocation5], 4294967280 }
 0x23d   :  { %341 = vsyncpa [#allocation4], 1 }
 0x23e   :  { %342 = vsyncpa [#allocation7], 1 }
 0x23f   :  { %343 = vsyncpa [#allocation5], 1 }

// kernel: tpu_custom_call.1
= control target key start
LH: loop header
LB: loop body
LE: loop exit
PB: predicated region body
PF: predicated region fallthrough
CT: control target
= control target key end

     0   :  { %s607_s0 = inlined_call_operand.hbm [shape: f32[64,128], index: 0, kind: input, shape index: {}]   ;;  %s608_s1 = inlined_call_operand.hbm [shape: f32[128,256], index: 1, kind: input, shape index: {}]   ;;  %s609_s2 = inlined_call_operand.vmem [shape: f32[1,256], index: 2, kind: input, shape index: {}]   ;;  %s610_s3 = inlined_call_operand.hbm [shape: f32[8,256], index: 3, kind: input, shape index: {}]   ;;  %s611_s4 = inlined_call_operand.<no memory space> [shape: f32[1,1], index: 4, kind: input, shape index: {}]   ;;  %s612_s5 = inlined_call_operand.hbm [shape: f32[1,64], index: 5, kind: output, shape index: {}]  }
   0x1   :  { %v10_v0 = vstv %s611_s4 }
   0x2   :  { %11 = vst [vmem:[#allocation2] sm:$0x1] %v10_v0 }
   0x3   :  { %12 = vsyncpa [#allocation4], 0 }
   0x4   :  { %13 = vsyncpa [#allocation7], 0 }
   0x5   :  { %14 = vsyncpa [#allocation5], 0  ;;  %s497_s20 = smov [#allocation6]   ;;  %s403_s24 = scalar_lea.hbm %s608_s1, 4096 }
   0x6   :  { %s32_s21 = sshll.u32 %s497_s20, 4  ;;  %p404_p0 = scmp.ne.s32.totalorder %s608_s1, %s403_s24  ;;  %s33_s21 = int_to_ptr.vmem [resolvable:$true] %s32_s21 }
   0x7   :  { %p407_p1 = scmp.lt.u32.totalorder %s403_s24, %s608_s1 }
   0x9   :  { %p409_p2 = pnand %p407_p1, %p404_p0 }
   0xb   :  { %412 = shalt.err (!%p409_p2)
}
   0xc   :  { %s413_s4 = scalar_lea.vmem %s33_s21, 4096  ;;  %p418_p4 = scmp.lt.s32.totalorder %s33_s21, %s33_s21 }
   0xd   :  { %p414_p3 = scmp.ne.s32.totalorder %s33_s21, %s413_s4  ;;  %p419_p5 = scmp.lt.s32.totalorder %s413_s4, %s413_s4 }
   0xf   :  { %p420_p6 = por %p419_p5, %p418_p4 }
  0x11   :  { %p421_p7 = pnand %p420_p6, %p414_p3 }
  0x13   :  { %424 = shalt.err (!%p421_p7)
}
  0x14   :  { %s498_s29 = smov 256   ;;  %s499_s30 = smov 16  }
  0x15   :  { %38 = dma.hbm_to_vmem [thread:$0]  %s608_s1, 4096, %s33_s21, [#allocation7], %s498_s29, %s498_s29, %s499_s30  }
  0x16   :  { %s500_s8 = smov [#allocation3]   ;;  %s425_s12 = scalar_lea.hbm %s607_s0, 1024 }
  0x17   :  { %s20_s9 = sshll.u32 %s500_s8, 4  ;;  %p426_p8 = scmp.ne.s32.totalorder %s607_s0, %s425_s12  ;;  %s21_s9 = int_to_ptr.vmem [resolvable:$true] %s20_s9 }
  0x18   :  { %p429_p9 = scmp.lt.u32.totalorder %s425_s12, %s607_s0 }
  0x1a   :  { %p431_p10 = pnand %p429_p9, %p426_p8 }
  0x1c   :  { %434 = shalt.err (!%p431_p10)
}
  0x1d   :  { %s435_s17 = scalar_lea.vmem %s21_s9, 1024  ;;  %p440_p12 = scmp.lt.s32.totalorder %s21_s9, %s21_s9 }
  0x1e   :  { %p436_p11 = scmp.ne.s32.totalorder %s21_s9, %s435_s17  ;;  %p441_p13 = scmp.lt.s32.totalorder %s435_s17, %s435_s17 }
  0x20   :  { %p442_p0 = por %p441_p13, %p440_p12 }
  0x22   :  { %p443_p1 = pnand %p442_p0, %p436_p11 }
  0x24   :  { %446 = shalt.err (!%p443_p1)
}
  0x25   :  { %s501_s1 = smov 128   ;;  %s502_s18 = smov 8  }
  0x26   :  { %26 = dma.hbm_to_vmem [thread:$0]  %s607_s0, 1024, %s21_s9, [#allocation4], %s501_s1, %s501_s1, %s502_s18  }
  0x27   :  { %s503_s21 = smov [#allocation8]   ;;  %s447_s25 = scalar_lea.hbm %s610_s3, 256 }
  0x28   :  { %s47_s22 = sshll.u32 %s503_s21, 4  ;;  %p448_p2 = scmp.ne.s32.totalorder %s610_s3, %s447_s25  ;;  %s48_s22 = int_to_ptr.vmem [resolvable:$true] %s47_s22 }
  0x29   :  { %p451_p3 = scmp.lt.u32.totalorder %s447_s25, %s610_s3 }
  0x2b   :  { %p453_p4 = pnand %p451_p3, %p448_p2 }
  0x2d   :  { %456 = shalt.err (!%p453_p4)
}
  0x2e   :  { %s457_s29 = scalar_lea.vmem %s48_s22, 256  ;;  %p462_p6 = scmp.lt.s32.totalorder %s48_s22, %s48_s22 }
  0x2f   :  { %p458_p5 = scmp.ne.s32.totalorder %s48_s22, %s457_s29  ;;  %p463_p7 = scmp.lt.s32.totalorder %s457_s29, %s457_s29 }
  0x31   :  { %p464_p8 = por %p463_p7, %p462_p6 }
  0x33   :  { %p465_p9 = pnand %p464_p8, %p458_p5 }
  0x35   :  { %468 = shalt.err (!%p465_p9)
}
  0x36   :  { %50 = dma.hbm_to_vmem [thread:$0]  %s610_s3, 256, %s48_s22, [#allocation7]  }
  0x37   :  { %491 = dma.done.wait [#allocation4], 1024  }
  0x38   :  { %492 = vsyncadd [#allocation4], 4294966272 }
  0x39   :  { %493 = dma.done.wait [#allocation7], 4352  }
  0x3a   :  { %494 = vsyncadd [#allocation7], 4294962944  ;;  %v504_v1 = vmov 0.0   ;;  %v71_v2 = vld [vmem:[#allocation6 + $0x8] sm:$0xff]  ;;  %v73_v3 = vld [vmem:[#allocation6 + $0x18] sm:$0xff]  ;;  %v505_v60 = vmov 0   ;;  %v104_v61 = vlaneseq }
  0x3b   :  { %178 = vmatprep.mubr.f32.mxu0 %v504_v1  ;;  %v70_v4 = vld [vmem:[#allocation6] sm:$0xff]  ;;  %v344_v5 = vpack.c.bf16 %v73_v3, %v71_v2  ;;  %v72_v6 = vld [vmem:[#allocation6 + $0x10] sm:$0xff]  ;;  %v75_v7 = vld [vmem:[#allocation6 + $0x28] sm:$0xff]  ;;  %402 = vset.pattern.permute.xlu0 %v505_v60  ;;  %vm326_vm0 = vcmask 516096  }
  0x3c   :  { %v77_v8 = vld [vmem:[#allocation6 + $0x38] sm:$0xff]  ;;  %v346_v9 = vpack.c.bf16 %v72_v6, %v70_v4  ;;  %v74_v11 = vld [vmem:[#allocation6 + $0x20] sm:$0xff]  ;;  %v76_v12 = vld [vmem:[#allocation6 + $0x30] sm:$0xff]  ;;  %v584_v62 = vshrl.u32 %v104_v61, 7 }
  0x3d   :  { %v348_v10 = vpack.c.bf16 %v77_v8, %v75_v7  ;;  %v79_v13 = vld [vmem:[#allocation6 + $0x48] sm:$0xff]  ;;  %345 = vmatprep.subr.bf16.mxu0 %v344_v5  ;;  %v81_v14 = vld [vmem:[#allocation6 + $0x58] sm:$0xff]  ;;  %v350_v15 = vpack.c.bf16 %v76_v12, %v74_v11  ;;  %v78_v17 = vld [vmem:[#allocation6 + $0x40] sm:$0xff] }
  0x3e   :  { %347 = vmatpush1.bf16.msra.mxu0 %v346_v9  ;;  %v352_v16 = vpack.c.bf16 %v81_v14, %v79_v13  ;;  %v80_v18 = vld [vmem:[#allocation6 + $0x50] sm:$0xff]  ;;  %v83_v19 = vld [vmem:[#allocation6 + $0x68] sm:$0xff]  ;;  %v85_v20 = vld [vmem:[#allocation6 + $0x78] sm:$0xff]  ;;  %v106_v63 = vsub.s32 0, %v584_v62  ;;  %v110_v2 = vsub.s32 1, %v584_v62 }
  0x3f   :  { %349 = vmatprep.subr.bf16.mxu0 %v348_v10  ;;  %v354_v21 = vpack.c.bf16 %v80_v18, %v78_v17  ;;  %v356_v22 = vpack.c.bf16 %v85_v20, %v83_v19  ;;  %v82_v23 = vld [vmem:[#allocation6 + $0x60] sm:$0xff]  ;;  %v84_v24 = vld [vmem:[#allocation6 + $0x70] sm:$0xff]  ;;  %v87_v25 = vld [vmem:[#allocation6 + $0x88] sm:$0xff] }
  0x40   :  { %v89_v26 = vld [vmem:[#allocation6 + $0x98] sm:$0xff]  ;;  %v358_v27 = vpack.c.bf16 %v84_v24, %v82_v23  ;;  %v86_v29 = vld [vmem:[#allocation6 + $0x80] sm:$0xff]  ;;  %v88_v30 = vld [vmem:[#allocation6 + $0x90] sm:$0xff] }
  0x41   :  { %v360_v28 = vpack.c.bf16 %v89_v26, %v87_v25  ;;  %v91_v31 = vld [vmem:[#allocation6 + $0xa8] sm:$0xff]  ;;  %v93_v32 = vld [vmem:[#allocation6 + $0xb8] sm:$0xff]  ;;  %v362_v33 = vpack.c.bf16 %v88_v30, %v86_v29  ;;  %v90_v35 = vld [vmem:[#allocation6 + $0xa0] sm:$0xff] }
  0x42   :  { %351 = vmatpush1.bf16.msra.mxu0 %v350_v15  ;;  %v364_v34 = vpack.c.bf16 %v93_v32, %v91_v31  ;;  %v92_v36 = vld [vmem:[#allocation6 + $0xb0] sm:$0xff]  ;;  %v95_v37 = vld [vmem:[#allocation6 + $0xc8] sm:$0xff]  ;;  %v97_v38 = vld [vmem:[#allocation6 + $0xd8] sm:$0xff] }
  0x43   :  { %353 = vmatprep.subr.bf16.mxu0 %v352_v16  ;;  %v366_v39 = vpack.c.bf16 %v92_v36, %v90_v35  ;;  %v368_v40 = vpack.c.bf16 %v97_v38, %v95_v37  ;;  %v94_v41 = vld [vmem:[#allocation6 + $0xc0] sm:$0xff]  ;;  %v96_v42 = vld [vmem:[#allocation6 + $0xd0] sm:$0xff]  ;;  %v99_v43 = vld [vmem:[#allocation6 + $0xe8] sm:$0xff] }
  0x44   :  { %v101_v44 = vld [vmem:[#allocation6 + $0xf8] sm:$0xff]  ;;  %v370_v45 = vpack.c.bf16 %v96_v42, %v94_v41  ;;  %v98_v47 = vld [vmem:[#allocation6 + $0xe0] sm:$0xff]  ;;  %v100_v48 = vld [vmem:[#allocation6 + $0xf0] sm:$0xff] }
  0x45   :  { %v372_v46 = vpack.c.bf16 %v101_v44, %v99_v43  ;;  %v374_v49 = vpack.c.bf16 %v100_v48, %v98_v47  ;;  %v62_v50 = vld [vmem:[#allocation3] sm:$0xff]  ;;  %v63_v51 = vld [vmem:[#allocation3 + $0x8] sm:$0xff]  ;;  %v64_v52 = vld [vmem:[#allocation3 + $0x10] sm:$0xff] }
  0x46   :  { %355 = vmatpush1.bf16.msra.mxu0 %v354_v21  ;;  %v65_v53 = vld [vmem:[#allocation3 + $0x18] sm:$0xff]  ;;  %v66_v54 = vld [vmem:[#allocation3 + $0x20] sm:$0xff]  ;;  %v67_v55 = vld [vmem:[#allocation3 + $0x28] sm:$0xff] }
  0x47   :  { %357 = vmatprep.subr.bf16.mxu0 %v356_v22  ;;  %v68_v56 = vld [vmem:[#allocation3 + $0x30] sm:$0xff]  ;;  %v69_v57 = vld [vmem:[#allocation3 + $0x38] sm:$0xff]  ;;  %v244_v58 = vld [vmem:[#allocation8 + $0x8] sm:$0xff] }
  0x48   :  { %309 = vmatprep.mubr.f32.mxu1 %v244_v58  ;;  %v315_v59 = vld [vmem:[#allocation2] sm:$0x1]  ;;  %v243_v60 = vld [vmem:[#allocation8] sm:$0xff] }
  0x49   :  { %318 = vperm.xlu0 %402, %v315_v59   ;;  %v102_v0 = vld [vmem:[%s609_s2] sm:$0x3]  ;;  %s506_s2 = smov [#allocation9]  }
  0x4a   :  { %359 = vmatpush1.bf16.msra.mxu0 %v358_v27  ;;  %v111_v4 = vrot.slane %v102_v0, %v110_v2  ;;  %s334_s7 = sshll.u32 %s506_s2, 4  ;;  %s335_s7 = int_to_ptr.vmem [resolvable:$true] %s334_s7 }
  0x4b   :  { %361 = vmatprep.subr.bf16.mxu0 %v360_v28  ;;  %s469_s8 = scalar_lea.vmem %s335_s7, 16  ;;  %s473_s9 = scalar_lea.vmem %s335_s7, 32 }
  0x4c   :  { %p470_p10 = scmp.ne.s32.totalorder %s335_s7, %s469_s8  ;;  %p474_p11 = scmp.lt.s32.totalorder %s335_s7, %s335_s7 }
  0x4d   :  { %p475_p12 = scmp.lt.s32.totalorder %s473_s9, %s469_s8 }
  0x4e   :  { %363 = vmatpush1.bf16.msra.mxu0 %v362_v33 }
  0x4f   :  { %365 = vmatprep.subr.bf16.mxu0 %v364_v34  ;;  %p476_p13 = por %p475_p12, %p474_p11 }
  0x51   :  { %p477_p0 = pnand %p476_p13, %p470_p10 }
  0x52   :  { %367 = vmatpush1.bf16.msra.mxu0 %v366_v39 }
  0x53   :  { %369 = vmatprep.subr.bf16.mxu0 %v368_v40 }
  0x56   :  { %371 = vmatpush1.bf16.msra.mxu0 %v370_v45 }
  0x57   :  { %373 = vmatprep.subr.bf16.mxu0 %v372_v46 }
  0x5a   :  { %375 = vmatpush1.bf16.msra.mxu0 %v374_v49 }
  0x5d   :  { %179 = vmatmul.mubr.f32.vlgmr.msra.gmra.mrb[0].mxu0 %v62_v50 }
  0x5e   :  { %184 = vmatprep.mubr.f32.mxu0 %v504_v1 }
  0x61   :  { %185 = vmatmul.mubr.f32.gmra.mrb[2].mxu0 %v63_v51 }
  0x62   :  { %190 = vmatprep.mubr.f32.mxu0 %v504_v1 }
  0x65   :  { %191 = vmatmul.mubr.f32.gmra.mrb[4].mxu0 %v64_v52 }
  0x66   :  { %196 = vmatprep.mubr.f32.mxu0 %v504_v1 }
  0x69   :  { %197 = vmatmul.mubr.f32.gmra.mrb[6].mxu0 %v65_v53 }
  0x6a   :  { %202 = vmatprep.mubr.f32.mxu0 %v504_v1 }
  0x6d   :  { %203 = vmatmul.mubr.f32.gmra.mrb[8].mxu0 %v66_v54 }
  0x6e   :  { %208 = vmatprep.mubr.f32.mxu0 %v504_v1 }
  0x71   :  { %209 = vmatmul.mubr.f32.gmra.mrb[10].mxu0 %v67_v55 }
  0x72   :  { %214 = vmatprep.mubr.f32.mxu0 %v504_v1 }
  0x75   :  { %215 = vmatmul.mubr.f32.gmra.mrb[12].mxu0 %v68_v56 }
  0x76   :  { %220 = vmatprep.mubr.f32.mxu0 %v504_v1  ;;  %v107_v1 = vrot.slane %v102_v0, %v106_v63 }
  0x79   :  { %221 = vmatmul.mubr.f32.gmra.mrb[14].mxu0 %v69_v57 }
  0xc8   :  { %v319_v61 = vpop.permute.xlu0 %318 }
  0xc9   :  { %v324_v0 = vrot.slane %v319_v61, %v106_v63 }
 0x130   :  { %v180_v3 = vpop.f32.mrb[0].mxu0 }
 0x131   :  { %v182_v5 = vpop.f32.mrb[1].mxu0  ;;  %v181_v6 = vadd.f32 %v180_v3, %v107_v1 }
 0x132   :  { %v183_v7 = vadd.f32 %v182_v5, %v111_v4 }
 0x133   :  { %v227_v12 = vmax.f32 %v181_v6, 0.0 }
 0x134   :  { %v186_v8 = vpop.f32.mrb[2].mxu0  ;;  %v228_v14 = vmax.f32 %v183_v7, 0.0 }
 0x135   :  { %v187_v9 = vadd.f32 %v186_v8, %v107_v1  ;;  %v188_v10 = vpop.f32.mrb[3].mxu0 }
 0x136   :  { %v189_v11 = vadd.f32 %v188_v10, %v111_v4 }
 0x137   :  { %v229_v13 = vmax.f32 %v187_v9, 0.0 }
 0x138   :  { %v230_v15 = vmax.f32 %v189_v11, 0.0  ;;  %v192_v16 = vpop.f32.mrb[4].mxu0 }
 0x139   :  { %v194_v17 = vpop.f32.mrb[5].mxu0  ;;  %v378_v18 = vpack.c.bf16 %v229_v13, %v227_v12  ;;  %v193_v20 = vadd.f32 %v192_v16, %v107_v1 }
 0x13a   :  { %v376_v19 = vpack.c.bf16 %v230_v15, %v228_v14  ;;  %v195_v21 = vadd.f32 %v194_v17, %v111_v4 }
 0x13b   :  { %v231_v26 = vmax.f32 %v193_v20, 0.0 }
 0x13c   :  { %v198_v22 = vpop.f32.mrb[6].mxu0  ;;  %377 = vmatprep.subr.bf16.mxu1 %v376_v19  ;;  %v232_v28 = vmax.f32 %v195_v21, 0.0 }
 0x13d   :  { %v199_v23 = vadd.f32 %v198_v22, %v107_v1  ;;  %v200_v24 = vpop.f32.mrb[7].mxu0  ;;  %379 = vmatpush1.bf16.xpose.msra.mxu1 %v378_v18 }
 0x13e   :  { %v201_v25 = vadd.f32 %v200_v24, %v111_v4 }
 0x13f   :  { %v233_v27 = vmax.f32 %v199_v23, 0.0 }
 0x140   :  { %v234_v29 = vmax.f32 %v201_v25, 0.0  ;;  %v204_v30 = vpop.f32.mrb[8].mxu0 }
 0x141   :  { %v382_v31 = vpack.c.bf16 %v233_v27, %v231_v26  ;;  %v206_v32 = vpop.f32.mrb[9].mxu0  ;;  %v205_v34 = vadd.f32 %v204_v30, %v107_v1 }
 0x142   :  { %v380_v33 = vpack.c.bf16 %v234_v29, %v232_v28  ;;  %v207_v35 = vadd.f32 %v206_v32, %v111_v4 }
 0x143   :  { %v235_v40 = vmax.f32 %v205_v34, 0.0 }
 0x144   :  { %v210_v36 = vpop.f32.mrb[10].mxu0  ;;  %381 = vmatprep.subr.bf16.mxu1 %v380_v33  ;;  %v236_v42 = vmax.f32 %v207_v35, 0.0 }
 0x145   :  { %v211_v37 = vadd.f32 %v210_v36, %v107_v1  ;;  %v212_v38 = vpop.f32.mrb[11].mxu0  ;;  %383 = vmatpush1.bf16.xpose.msra.mxu1 %v382_v31 }
 0x146   :  { %v213_v39 = vadd.f32 %v212_v38, %v111_v4 }
 0x147   :  { %v237_v41 = vmax.f32 %v211_v37, 0.0 }
 0x148   :  { %v238_v43 = vmax.f32 %v213_v39, 0.0  ;;  %v216_v44 = vpop.f32.mrb[12].mxu0 }
 0x149   :  { %v386_v45 = vpack.c.bf16 %v237_v41, %v235_v40  ;;  %v218_v46 = vpop.f32.mrb[13].mxu0  ;;  %v217_v48 = vadd.f32 %v216_v44, %v107_v1 }
 0x14a   :  { %v384_v47 = vpack.c.bf16 %v238_v43, %v236_v42  ;;  %v219_v49 = vadd.f32 %v218_v46, %v111_v4 }
 0x14b   :  { %v239_v54 = vmax.f32 %v217_v48, 0.0 }
 0x14c   :  { %v222_v50 = vpop.f32.mrb[14].mxu0  ;;  %385 = vmatprep.subr.bf16.mxu1 %v384_v47  ;;  %v240_v56 = vmax.f32 %v219_v49, 0.0 }
 0x14d   :  { %v223_v51 = vadd.f32 %v222_v50, %v107_v1  ;;  %v224_v52 = vpop.f32.mrb[15].mxu0  ;;  %387 = vmatpush1.bf16.xpose.msra.mxu1 %v386_v45 }
 0x14e   :  { %v225_v53 = vadd.f32 %v224_v52, %v111_v4 }
 0x14f   :  { %v241_v55 = vmax.f32 %v223_v51, 0.0 }
 0x150   :  { %v242_v57 = vmax.f32 %v225_v53, 0.0 }
 0x151   :  { %v390_v58 = vpack.c.bf16 %v241_v55, %v239_v54 }
 0x152   :  { %v388_v59 = vpack.c.bf16 %v242_v57, %v240_v56 }
 0x154   :  { %389 = vmatprep.subr.bf16.mxu1 %v388_v59 }
 0x155   :  { %391 = vmatpush1.bf16.xpose.msra.mxu1 %v390_v58 }
 0x15c   :  { %310 = vmatmul.mubr.f32.vlgmr.msra.gmra.mrb[0].mxu1 %v243_v60 }
 0x22f   :  { %v311_v2 = vpop.f32.mrb[0].mxu1 }
 0x230   :  { %v325_v1 = vadd.f32 %v324_v0, %v311_v2  ;;  %v313_v3 = vpop.f32.mrb[1].mxu1 }
 0x232   :  { %327 = vst.msk [vmem:[#allocation9] sm:$0x1] %vm326_vm0, %v325_v1 }
 0x233   :  { %480 = shalt.err (!%p477_p0)
}
 0x234   :  { %s481_s12 = scalar_lea.hbm %s612_s5, 16 }
 0x235   :  { %p482_p1 = scmp.ne.s32.totalorder %s612_s5, %s481_s12  ;;  %p485_p2 = scmp.lt.u32.totalorder %s481_s12, %s612_s5 }
 0x237   :  { %p487_p3 = pnand %p485_p2, %p482_p1 }
 0x239   :  { %490 = shalt.err (!%p487_p3)
}
 0x23a   :  { %337 = dma.vmem_to_hbm [thread:$0]  %s335_s7, 16, %s612_s5, [#allocation5]  }
 0x23b   :  { %495 = dma.done.wait [#allocation5], 16  }
 0x23c   :  { %496 = vsyncadd [#allocation5], 4294967280 }
 0x23d   :  { %341 = vsyncpa [#allocation4], 1 }
 0x23e   :  { %342 = vsyncpa [#allocation7], 1 }
 0x23f   :  { %343 = vsyncpa [#allocation5], 1 }

</bundles_post_ra>
